<compile_context>
chip_gen: v6e
topology: v6e:2x2x1
jax: 0.10.0
libtpu: 0.0.40
codegen_flags: <defaults>
</compile_context>

<pallas_src>
import functools
import math

import jax
import jax.numpy as jnp
from jax.experimental import pallas as pl
from jax.experimental.pallas import tpu as pltpu


_LANE_WIDTHS = (8192, 4096, 2048, 1024, 512, 256, 128)
_TARGET_OUT_BYTES_PER_BLOCK = 8 << 20   # ~8 MiB of output per grid step
_VMEM_LIMIT_CAP = 48 << 20              # stay well under v7x's 64 MiB physical VMEM


def _convert_kernel(x_ref, o_ref, *, scale):
    """Elementwise dtype conversion (+ optional scaling) on the VPU."""
    x = x_ref[...]
    if scale is None:
        # float -> float: pure cast.
        o_ref[...] = x.astype(o_ref.dtype)
    else:
        # int -> float: multiply by precomputed reciprocal (single VPU op;
        # matches x / max within 1 ULP, well inside 1e-6 tolerance).
        o_ref[...] = (x.astype(jnp.float32) * jnp.float32(scale)).astype(o_ref.dtype)


def _scale_for(in_dt, out_dt):
    if jnp.issubdtype(in_dt, jnp.integer) and jnp.issubdtype(out_dt, jnp.floating):
        return 1.0 / float(jnp.iinfo(in_dt).max)
    if jnp.issubdtype(in_dt, jnp.floating) and jnp.issubdtype(out_dt, jnp.floating):
        return None
    # TODO(synk): float->int and int->int conversion paths (saturating scale /
    # bit-shift) not needed for this synthetic demo.
    raise NotImplementedError("only int->float and float->float supported")


def _convert_small(x, out_dt, scale):
    """Plain-jnp conversion for tiny arrays / sub-128-element tails."""
    if scale is None:
        return x.astype(out_dt)
    return (x.astype(jnp.float32) * jnp.float32(scale)).astype(out_dt)


def _pick_layout(total, in_itemsize):
    """Pick (rows, lanes) with lanes a wide multiple of 128, keeping enough
    rows to fill sublanes (unmasked vregs): >=32 rows for 8-bit input,
    >=8 rows otherwise; widest lane count first within that constraint."""
    assert total % 128 == 0
    min_rows_pref = max(8, 32 // max(1, in_itemsize))
    for min_rows in (min_rows_pref, 8):
        for lanes in _LANE_WIDTHS:
            if total % lanes == 0 and total // lanes >= min_rows:
                return total // lanes, lanes
    # Tiny array: maximize rows with the narrowest lane width.
    return total // 128, 128


def _convert_2d(x2d, out_dt, scale, target_block_bytes):
    rows, lanes = x2d.shape
    in_itemsize = x2d.dtype.itemsize
    out_itemsize = jnp.dtype(out_dt).itemsize

    # ~target_block_bytes of output per block; sublane extent rounded up to a
    # multiple of 32 (native (32,128) tiling for u8/i8), clamped to the full
    # row extent for small arrays (full-dim blocks are always legal).
    rows_per_tile = max(1, target_block_bytes // (lanes * out_itemsize))
    rows_per_tile = ((rows_per_tile + 31) // 32) * 32
    tile_r = min(rows, rows_per_tile)
    grid = (pl.cdiv(rows, tile_r),)

    # Explicit VMEM budget: double-buffered input + output blocks + headroom.
    block_bytes = tile_r * lanes * (in_itemsize + out_itemsize)
    vmem_limit = int(min(2 * block_bytes + (4 << 20), _VMEM_LIMIT_CAP))

    return pl.pallas_call(
        functools.partial(_convert_kernel, scale=scale),
        out_shape=jax.ShapeDtypeStruct((rows, lanes), out_dt),
        grid=grid,
        in_specs=[pl.BlockSpec((tile_r, lanes), lambda i: (i, 0))],
        out_specs=pl.BlockSpec((tile_r, lanes), lambda i: (i, 0)),
        compiler_params=pltpu.CompilerParams(
            dimension_semantics=("parallel",),
            vmem_limit_bytes=vmem_limit,
        ),
    )(x2d)


def convert_image_dtype(image: jax.Array, dtype=jnp.float32,
                        _target_block_bytes: int = _TARGET_OUT_BYTES_PER_BLOCK) -> jax.Array:
    """JAX/Pallas equivalent of torchvision F.convert_image_dtype(image, dtype)."""
    in_dt = image.dtype
    out_dt = jnp.dtype(dtype)

    if in_dt == out_dt:
        return image

    scale = _scale_for(in_dt, out_dt)

    orig_shape = image.shape
    total = math.prod(orig_shape)
    if total == 0:
        return image.astype(out_dt)

    flat = image.reshape(-1)
    tail = total % 128
    aligned = total - tail

    if aligned == 0:
        # Sub-128-element array: a kernel launch is not worth it.
        return _convert_small(flat, out_dt, scale).reshape(orig_shape)

    rows, lanes = _pick_layout(aligned, in_dt.itemsize)
    body = flat[:aligned] if tail else flat
    out_flat = _convert_2d(body.reshape(rows, lanes), out_dt, scale,
                           _target_block_bytes).reshape(-1)

    if tail:
        # Convert the <128-element tail with plain jnp (no full-array pad/slice
        # round trips like the old fallback).
        out_tail = _convert_small(flat[aligned:], out_dt, scale)
        out_flat = jnp.concatenate([out_flat, out_tail])

    return out_flat.reshape(orig_shape)


class ConvertImageDtype:
    """Mirror of the PyTorch module: forward(image, target) -> (converted_image, target)."""

    def __init__(self, dtype=jnp.float32):
        self.dtype = dtype

    def __call__(self, image, target=None):
        return convert_image_dtype(image, self.dtype), target


if __name__ == "__main__":
    # Main case: NCHW uint8 image (batch=2, channels=4, spatial=16x16) -> float32.
    key = jax.random.PRNGKey(0)
    image_u8 = jax.random.randint(key, (2, 4, 16, 16), 0, 256, dtype=jnp.int32).astype(
        jnp.uint8
    )
    mod = ConvertImageDtype(jnp.float32)
    out, target = mod(image_u8, target=None)
    out = jax.block_until_ready(out)
    ref = image_u8.astype(jnp.float32) / 255.0
    assert out.shape == image_u8.shape
    assert out.dtype == jnp.float32
    assert target is None
    assert bool(jnp.allclose(out, ref, atol=1e-6, rtol=1e-6))

    # Non-128-aligned total: exercises the aligned-prefix + jnp-tail path.
    img2 = jax.random.randint(jax.random.PRNGKey(1), (3, 3, 17, 19), 0, 256,
                              dtype=jnp.int32).astype(jnp.uint8)
    out2 = jax.block_until_ready(convert_image_dtype(img2, jnp.float32))
    ref2 = img2.astype(jnp.float32) / 255.0
    assert out2.shape == img2.shape and out2.dtype == jnp.float32
    assert bool(jnp.allclose(out2, ref2, atol=1e-6, rtol=1e-6))

    # Ragged last grid block (rows % tile_r != 0) via an artificially small block target.
    img3 = jax.random.randint(jax.random.PRNGKey(2), (2, 4, 48, 64), 0, 256,
                              dtype=jnp.int32).astype(jnp.uint8)
    out3 = jax.block_until_ready(
        convert_image_dtype(img3, jnp.float32, _target_block_bytes=64 * 1024))
    ref3 = img3.astype(jnp.float32) / 255.0
    assert bool(jnp.allclose(out3, ref3, atol=1e-6, rtol=1e-6))

    # float -> float pure cast.
    imgf = jax.random.uniform(jax.random.PRNGKey(3), (2, 4, 16, 16), dtype=jnp.float32)
    outf = jax.block_until_ready(convert_image_dtype(imgf, jnp.bfloat16))
    assert outf.dtype == jnp.bfloat16
    assert bool(jnp.allclose(outf.astype(jnp.float32),
                             imgf.astype(jnp.bfloat16).astype(jnp.float32)))

    print("KERNEL_OK")
</pallas_src>

<mosaic_0001>
module attributes {stable_mosaic.version = 11 : i64} {
  func.func @_convert_kernel(%arg0: i32, %arg1: memref<8x256xi8, #tpu.memory_space<vmem>>, %arg2: memref<8x256xf32, #tpu.memory_space<vmem>>) attributes {dimension_semantics = [#tpu.dimension_semantics<parallel>], iteration_bounds = array<i64: 1>, scalar_prefetch = 0 : i64, scratch_operands = 0 : i64, tpu.core_type = #tpu.core_type<tc>, window_params = [{transform_indices = @transform_0, window_bounds = array<i64: 8, 256>}, {transform_indices = @transform_1, window_bounds = array<i64: 8, 256>}]} {
    %c0 = arith.constant 0 : index
    %c0_0 = arith.constant 0 : index
    %0 = vector.load %arg1[%c0, %c0_0] : memref<8x256xi8, #tpu.memory_space<vmem>>, vector<8x256xi8>
    %1 = arith.uitofp %0 : vector<8x256xi8> to vector<8x256xf32>
    %cst = arith.constant 0.00392156886 : f32
    %2 = vector.broadcast %cst : f32 to vector<8x256xf32>
    %3 = arith.mulf %1, %2 : vector<8x256xf32>
    %c0_1 = arith.constant 0 : index
    %c0_2 = arith.constant 0 : index
    %4 = vector.load %arg2[%c0_1, %c0_2] : memref<8x256xf32, #tpu.memory_space<vmem>>, vector<8x256xf32>
    tpu.vector_store %arg2[%c0_1, %c0_2], %3 {strides = array<i32>} : memref<8x256xf32, #tpu.memory_space<vmem>>, vector<8x256xf32>,
    return
  }
  func.func @transform_0(%arg0: i32) -> (i32, i32) {
    %c0_i32 = arith.constant 0 : i32
    %c0_i32_0 = arith.constant 0 : i32
    return %arg0, %c0_i32 : i32, i32
  }
  func.func @transform_1(%arg0: i32) -> (i32, i32) {
    %c0_i32 = arith.constant 0 : i32
    %c0_i32_0 = arith.constant 0 : i32
    return %arg0, %c0_i32 : i32, i32
  }
}

</mosaic_0001>

<bundles_post_ra>
// kernel: tpu_custom_call.1
= control target key start
LH: loop header
LB: loop body
LE: loop exit
PB: predicated region body
PF: predicated region fallthrough
CT: control target
= control target key end

     0   :  { %6 = vsyncpa [#allocation3], 0  ;;  %s111_s0 = inlined_call_operand.hbm [shape: u8[8,256], index: 0, kind: input, shape index: {}]   ;;  %s112_s1 = inlined_call_operand.hbm [shape: f32[8,256], index: 1, kind: output, shape index: {}]  }
   0x1   :  { %7 = vsyncpa [#allocation4], 0  ;;  %s93_s6 = smov [#allocation2]  }
   0x2   :  { %s14_s7 = sshll.u32 %s93_s6, 4  ;;  %s15_s7 = int_to_ptr.vmem [resolvable:$true] %s14_s7 }
   0x3   :  { %s57_s8 = scalar_lea.vmem %s15_s7, 64  ;;  %p62_p1 = scmp.lt.s32.totalorder %s15_s7, %s15_s7 }
   0x4   :  { %p58_p0 = scmp.ne.s32.totalorder %s15_s7, %s57_s8  ;;  %p63_p2 = scmp.lt.s32.totalorder %s57_s8, %s57_s8 }
   0x6   :  { %p64_p3 = por %p63_p2, %p62_p1 }
   0x8   :  { %p65_p4 = pnand %p64_p3, %p58_p0 }
   0xa   :  { %68 = shalt.err (!%p65_p4)
}
   0xb   :  { %17 = dma.hbm_to_vmem [thread:$0]  %s111_s0, 64, %s15_s7, [#allocation3]  }
   0xc   :  { %89 = dma.done.wait [#allocation3], 64  }
   0xd   :  { %90 = vsyncadd [#allocation3], 4294967232  ;;  %v21_v0 = vld [vmem:[#allocation2] sm:$0xf]  ;;  %s94_s11 = smov [#allocation5]  }
   0xe   :  { %v22_v1 = vunpack.c.0.s8 %v21_v0  ;;  %v23_v2 = vunpack.c.1.s8 %v21_v0  ;;  %s38_s12 = sshll.u32 %s94_s11, 4  ;;  %s39_s12 = int_to_ptr.vmem [resolvable:$true] %s38_s12 }
   0xf   :  { %s69_s13 = scalar_lea.vmem %s39_s12, 256  ;;  %p74_p6 = scmp.lt.s32.totalorder %s39_s12, %s39_s12 }
  0x10   :  { %v24_v3 = vand.u32 255, %v22_v1  ;;  %v25_v4 = vand.u32 255, %v23_v2  ;;  %p70_p5 = scmp.ne.s32.totalorder %s39_s12, %s69_s13  ;;  %p75_p7 = scmp.lt.s32.totalorder %s69_s13, %s69_s13 }
  0x12   :  { %v26_v5 = vcvt.s32.f32 %v24_v3  ;;  %v27_v6 = vcvt.s32.f32 %v25_v4  ;;  %p76_p8 = por %p75_p7, %p74_p6 }
  0x14   :  { %v28_v7 = vmul.f32 0.003921569, %v26_v5  ;;  %v29_v8 = vmul.f32 0.003921569, %v27_v6  ;;  %p77_p9 = pnand %p76_p8, %p70_p5 }
  0x16   :  { %30 = vst [vmem:[#allocation5] sm:$0xff] %v28_v7  ;;  %31 = vst [vmem:[#allocation5 + $0x8] sm:$0xff] %v29_v8 }
  0x17   :  { %80 = shalt.err (!%p77_p9)
}
  0x18   :  { %41 = dma.vmem_to_hbm [thread:$0]  %s39_s12, 256, %s112_s1, [#allocation4]  }
  0x19   :  { %91 = dma.done.wait [#allocation4], 256  }
  0x1a   :  { %92 = vsyncadd [#allocation4], 4294967040 }
  0x1b   :  { %45 = vsyncpa [#allocation3], 1 }
  0x1c   :  { %46 = vsyncpa [#allocation4], 1 }

</bundles_post_ra>
